<compile_context>
chip_gen: v6e
topology: v6e:2x2x1
jax: 0.10.0
libtpu: 0.0.40
codegen_flags: <defaults>
</compile_context>

<pallas_src>
import functools

import jax
import jax.numpy as jnp
from jax.experimental import pallas as pl
from jax.experimental.pallas import tpu as pltpu

_LANE = 128      # vreg lane width
_SUBLANE = 16    # row-tile multiple (covers bf16 sublane packing on v5e)


def _round_up(x, m):
    return ((x + m - 1) // m) * m


def _round_down(x, m):
    return max((x // m) * m, m)


# ---------------------------------------------------------------------------
# Kernels
# ---------------------------------------------------------------------------
def _ln_rows_kernel(x_ref, w_ref, b_ref, o_ref, *, eps):
    """Normalize each row of a (TM, C) tile over the lane (C) axis."""
    x = x_ref[...].astype(jnp.float32)            # f32 compute (v5e mandatory)
    # [R5] one-pass stats: both cross-lane reductions issue back-to-back.
    s1 = jnp.mean(x, axis=-1, keepdims=True)
    s2 = jnp.mean(x * x, axis=-1, keepdims=True)
    var = jnp.maximum(s2 - s1 * s1, 0.0)
    inv = jax.lax.rsqrt(var + eps)                # EUP (free slot)
    w = w_ref[...].astype(jnp.float32)            # [R6] hoisted once
    b = b_ref[...].astype(jnp.float32)
    o_ref[...] = ((x - s1) * inv * w + b).astype(o_ref.dtype)


def _ln_sublane_kernel(x_ref, w_ref, b_ref, o_ref, *, eps):
    """Normalize each lane column of a (1, C, T) tile over the sublane (C) axis."""
    x = x_ref[...].astype(jnp.float32)
    s1 = jnp.mean(x, axis=1, keepdims=True)
    s2 = jnp.mean(x * x, axis=1, keepdims=True)
    var = jnp.maximum(s2 - s1 * s1, 0.0)
    inv = jax.lax.rsqrt(var + eps)
    w = w_ref[...].astype(jnp.float32)            # (1, C, 1) broadcasts over lanes
    b = b_ref[...].astype(jnp.float32)
    o_ref[...] = ((x - s1) * inv * w + b).astype(o_ref.dtype)


# ---------------------------------------------------------------------------
# Wrappers
# ---------------------------------------------------------------------------
def _layer_norm_lastdim(x, weight, bias, eps, *, vmem_budget_bytes=16 << 20):
    """LayerNorm over the last dim of x (any leading shape).

    NOTE [review]: when C < 128 the output last dim is lane-sparse (masked
    partial stores at ~C/128 lane occupancy); this path is only
    bandwidth-efficient when C is a multiple of 128.  NCHW inputs should use
    the channels_first path below, which keeps H*W on the lane axis instead.
    """
    orig_shape = x.shape
    c = int(orig_shape[-1])
    m = 1
    for d in orig_shape[:-1]:
        m *= int(d)
    x2 = x.reshape(m, c)                 # contiguous trailing merge: no HBM pass
    w2 = weight.reshape(1, c)
    b2 = bias.reshape(1, c)

    isz = jnp.dtype(x.dtype).itemsize
    # [R1] rows per tile against a double-buffered (in + out) VMEM budget.
    per_row = 2 * 2 * c * isz
    tile = max(vmem_budget_bytes // max(per_row, 1), _SUBLANE)
    tile = min(tile, 4096)
    if m <= _SUBLANE:
        tile = m                                       # single full-extent block
    else:
        if m > 2 * _SUBLANE:                           # keep >= 2 grid steps (v7x)
            tile = min(tile, _round_up(pl.cdiv(m, 2), _SUBLANE))
        tile = _round_down(min(tile, m), _SUBLANE)

    grid = (pl.cdiv(m, tile),)           # [R3] partial last block masked by Pallas

    buf_bytes = 2 * 2 * tile * c * isz + 4 * c * isz
    # [R2] scoped-VMEM limit with headroom, kept under v7x's 64 MiB physical.
    vmem_limit = int(min(max(buf_bytes + (16 << 20), 32 << 20), 48 << 20))

    cost = pl.CostEstimate(                            # [R6] scheduler hint
        flops=9 * m * c,
        transcendentals=m,
        bytes_accessed=2 * m * c * isz + 2 * c * jnp.dtype(weight.dtype).itemsize,
    )

    out = pl.pallas_call(
        functools.partial(_ln_rows_kernel, eps=eps),
        out_shape=jax.ShapeDtypeStruct((m, c), x.dtype),
        grid_spec=pltpu.PrefetchScalarGridSpec(
            num_scalar_prefetch=0,
            grid=grid,
            in_specs=[
                pl.BlockSpec((tile, c), lambda i: (i, 0)),
                pl.BlockSpec((1, c), lambda i: (0, 0)),
                pl.BlockSpec((1, c), lambda i: (0, 0)),
            ],
            out_specs=pl.BlockSpec((tile, c), lambda i: (i, 0)),
        ),
        compiler_params=pltpu.CompilerParams(
            dimension_semantics=("parallel",),
            vmem_limit_bytes=vmem_limit,
        ),
        cost_estimate=cost,
    )(x2, w2, b2)
    return out.reshape(orig_shape)


def _layer_norm_channels_first(x, weight, bias, eps, *, vmem_budget_bytes=16 << 20):
    """LayerNorm over the channel axis of an NCHW tensor, without transposes.

    [R4] The kernel reduces over the sublane (C) axis; the flattened H*W
    spatial axis stays last, so loads/stores are lane-dense even for tiny C.
    """
    b, c, h, w = (int(d) for d in x.shape)
    hw = h * w
    x3 = x.reshape(b, c, hw)             # contiguous trailing merge: no HBM pass
    w2 = weight.reshape(1, c, 1)
    b2 = bias.reshape(1, c, 1)

    isz = jnp.dtype(x.dtype).itemsize
    per_col = 2 * 2 * c * isz            # double-buffered (in + out) per lane col
    tile = max(vmem_budget_bytes // max(per_col, 1), _LANE)
    tile = min(tile, 1 << 15)
    if hw <= _LANE:
        tile = hw                                      # single full-extent block
    else:
        if b == 1 and hw > 2 * _LANE:                  # keep >= 2 steps (v7x)
            tile = min(tile, _round_up(pl.cdiv(hw, 2), _LANE))
        tile = _round_down(min(tile, hw), _LANE)

    grid = (b, pl.cdiv(hw, tile))        # [R3] partial last spatial block masked

    buf_bytes = 2 * 2 * c * tile * isz + 4 * c * isz
    vmem_limit = int(min(max(buf_bytes + (16 << 20), 32 << 20), 48 << 20))

    cost = pl.CostEstimate(
        flops=9 * b * c * hw,
        transcendentals=b * hw,
        bytes_accessed=2 * b * c * hw * isz + 2 * c * jnp.dtype(weight.dtype).itemsize,
    )

    out = pl.pallas_call(
        functools.partial(_ln_sublane_kernel, eps=eps),
        out_shape=jax.ShapeDtypeStruct((b, c, hw), x.dtype),
        grid_spec=pltpu.PrefetchScalarGridSpec(
            num_scalar_prefetch=0,
            grid=grid,
            in_specs=[
                pl.BlockSpec((1, c, tile), lambda bi, j: (bi, 0, j)),
                pl.BlockSpec((1, c, 1), lambda bi, j: (0, 0, 0)),
                pl.BlockSpec((1, c, 1), lambda bi, j: (0, 0, 0)),
            ],
            out_specs=pl.BlockSpec((1, c, tile), lambda bi, j: (bi, 0, j)),
        ),
        compiler_params=pltpu.CompilerParams(
            dimension_semantics=("parallel", "parallel"),
            vmem_limit_bytes=vmem_limit,
        ),
        cost_estimate=cost,
    )(x3, w2, b2)
    return out.reshape(b, c, h, w)


def layer_norm(x, weight, bias, eps=1e-6, data_format="channels_last",
               vmem_budget_bytes=16 << 20):
    """Matches the PyTorch module's LayerNorm.forward for both data formats."""
    if data_format == "channels_last":
        return _layer_norm_lastdim(x, weight, bias, eps,
                                   vmem_budget_bytes=vmem_budget_bytes)
    elif data_format == "channels_first":
        return _layer_norm_channels_first(x, weight, bias, eps,
                                          vmem_budget_bytes=vmem_budget_bytes)
    else:
        raise NotImplementedError(data_format)


if __name__ == "__main__":
    key = jax.random.PRNGKey(0)
    k1, k2, k3 = jax.random.split(key, 3)

    # --- channels_first: NCHW (B, C, H, W), normalized over C (no transposes) ---
    C = 4
    x_cf = jax.random.normal(k1, (2, C, 16, 16), dtype=jnp.float32)
    w_cf = jnp.ones((C,), dtype=jnp.float32)      # module __init__ values
    b_cf = jnp.zeros((C,), dtype=jnp.float32)
    y_cf = jax.block_until_ready(
        layer_norm(x_cf, w_cf, b_cf, eps=1e-6, data_format="channels_first"))

    u = jnp.mean(x_cf, axis=1, keepdims=True)
    s = jnp.mean((x_cf - u) ** 2, axis=1, keepdims=True)
    ref_cf = (x_cf - u) / jnp.sqrt(s + 1e-6)
    ref_cf = w_cf[None, :, None, None] * ref_cf + b_cf[None, :, None, None]
    assert jnp.allclose(y_cf, ref_cf, atol=1e-4), "channels_first mismatch"

    # --- channels_last: (B, H, W, C), normalized over the trailing C ---
    Cl = 32
    x_cl = jax.random.normal(k2, (2, 8, 8, Cl), dtype=jnp.float32)
    w_cl = jnp.ones((Cl,), dtype=jnp.float32)
    b_cl = jnp.zeros((Cl,), dtype=jnp.float32)
    y_cl = jax.block_until_ready(
        layer_norm(x_cl, w_cl, b_cl, eps=1e-6, data_format="channels_last"))

    u2 = jnp.mean(x_cl, axis=-1, keepdims=True)
    s2 = jnp.mean((x_cl - u2) ** 2, axis=-1, keepdims=True)
    ref_cl = (x_cl - u2) / jnp.sqrt(s2 + 1e-6) * w_cl + b_cl
    assert jnp.allclose(y_cl, ref_cl, atol=1e-4), "channels_last mismatch"

    # --- ragged row count: exercises the masked partial last block (no pad) ---
    x_rg = jax.random.normal(k3, (3, 7, 5, Cl), dtype=jnp.float32)
    y_rg = jax.block_until_ready(
        layer_norm(x_rg, w_cl, b_cl, eps=1e-6, data_format="channels_last"))
    u3 = jnp.mean(x_rg, axis=-1, keepdims=True)
    s3 = jnp.mean((x_rg - u3) ** 2, axis=-1, keepdims=True)
    ref_rg = (x_rg - u3) / jnp.sqrt(s3 + 1e-6) * w_cl + b_cl
    assert jnp.allclose(y_rg, ref_rg, atol=1e-4), "ragged channels_last mismatch"

    print("KERNEL_OK")
</pallas_src>

<mosaic_0001>
module attributes {stable_mosaic.version = 11 : i64} {
  func.func @_ln_sublane_kernel(%arg0: i32, %arg1: i32, %arg2: memref<1x4x256xf32, #tpu.memory_space<vmem>>, %arg3: memref<1x4x1xf32, #tpu.memory_space<vmem>>, %arg4: memref<1x4x1xf32, #tpu.memory_space<vmem>>, %arg5: memref<1x4x256xf32, #tpu.memory_space<vmem>>) attributes {dimension_semantics = [#tpu.dimension_semantics<parallel>, #tpu.dimension_semantics<parallel>], iteration_bounds = array<i64: 2, 1>, scalar_prefetch = 0 : i64, scratch_operands = 0 : i64, tpu.core_type = #tpu.core_type<tc>, window_params = [{transform_indices = @transform_0, window_bounds = array<i64: 1, 4, 256>}, {pipeline_mode = #tpu.pipeline_mode<synchronous>, transform_indices = @transform_1, window_bounds = array<i64: 1, 4, 1>}, {pipeline_mode = #tpu.pipeline_mode<synchronous>, transform_indices = @transform_2, window_bounds = array<i64: 1, 4, 1>}, {transform_indices = @transform_3, window_bounds = array<i64: 1, 4, 256>}]} {
    %c0 = arith.constant 0 : index
    %c0_0 = arith.constant 0 : index
    %c0_1 = arith.constant 0 : index
    %0 = vector.load %arg2[%c0, %c0_0, %c0_1] : memref<1x4x256xf32, #tpu.memory_space<vmem>>, vector<1x4x256xf32>
    %cst = arith.constant dense<0.000000e+00> : vector<1x256xf32>
    %1 = vector.multi_reduction <add>, %0, %cst [1] : vector<1x4x256xf32> to vector<1x256xf32>
    %2 = vector.shape_cast %1 : vector<1x256xf32> to vector<1x1x256xf32>
    %cst_2 = arith.constant 4.000000e+00 : f32
    %3 = vector.broadcast %cst_2 : f32 to vector<1x1x256xf32>
    %4 = arith.divf %2, %3 : vector<1x1x256xf32>
    %5 = arith.mulf %0, %0 : vector<1x4x256xf32>
    %cst_3 = arith.constant dense<0.000000e+00> : vector<1x256xf32>
    %6 = vector.multi_reduction <add>, %5, %cst_3 [1] : vector<1x4x256xf32> to vector<1x256xf32>
    %7 = vector.shape_cast %6 : vector<1x256xf32> to vector<1x1x256xf32>
    %cst_4 = arith.constant 4.000000e+00 : f32
    %8 = vector.broadcast %cst_4 : f32 to vector<1x1x256xf32>
    %9 = arith.divf %7, %8 : vector<1x1x256xf32>
    %10 = arith.mulf %4, %4 : vector<1x1x256xf32>
    %11 = arith.subf %9, %10 : vector<1x1x256xf32>
    %cst_5 = arith.constant 0.000000e+00 : f32
    %12 = vector.broadcast %cst_5 : f32 to vector<1x1x256xf32>
    %13 = arith.maximumf %11, %12 : vector<1x1x256xf32>
    %cst_6 = arith.constant 9.99999997E-7 : f32
    %14 = vector.broadcast %cst_6 : f32 to vector<1x1x256xf32>
    %15 = arith.addf %13, %14 : vector<1x1x256xf32>
    %16 = math.rsqrt %15 : vector<1x1x256xf32>
    %c0_7 = arith.constant 0 : index
    %c0_8 = arith.constant 0 : index
    %c0_9 = arith.constant 0 : index
    %17 = vector.load %arg3[%c0_7, %c0_8, %c0_9] : memref<1x4x1xf32, #tpu.memory_space<vmem>>, vector<1x4x1xf32>
    %c0_10 = arith.constant 0 : index
    %c0_11 = arith.constant 0 : index
    %c0_12 = arith.constant 0 : index
    %18 = vector.load %arg4[%c0_10, %c0_11, %c0_12] : memref<1x4x1xf32, #tpu.memory_space<vmem>>, vector<1x4x1xf32>
    %19 = vector.broadcast %4 : vector<1x1x256xf32> to vector<1x4x256xf32>
    %20 = arith.subf %0, %19 : vector<1x4x256xf32>
    %21 = vector.broadcast %16 : vector<1x1x256xf32> to vector<1x4x256xf32>
    %22 = arith.mulf %20, %21 : vector<1x4x256xf32>
    %23 = vector.broadcast %17 : vector<1x4x1xf32> to vector<1x4x256xf32>
    %24 = arith.mulf %22, %23 : vector<1x4x256xf32>
    %25 = vector.broadcast %18 : vector<1x4x1xf32> to vector<1x4x256xf32>
    %26 = arith.addf %24, %25 : vector<1x4x256xf32>
    %c0_13 = arith.constant 0 : index
    %c0_14 = arith.constant 0 : index
    %c0_15 = arith.constant 0 : index
    %27 = vector.load %arg5[%c0_13, %c0_14, %c0_15] : memref<1x4x256xf32, #tpu.memory_space<vmem>>, vector<1x4x256xf32>
    tpu.vector_store %arg5[%c0_13, %c0_14, %c0_15], %26 {strides = array<i32>} : memref<1x4x256xf32, #tpu.memory_space<vmem>>, vector<1x4x256xf32>,
    return
  }
  func.func @transform_0(%arg0: i32, %arg1: i32) -> (i32, i32, i32) {
    %c0_i32 = arith.constant 0 : i32
    %c0_i32_0 = arith.constant 0 : i32
    return %arg0, %c0_i32, %arg1 : i32, i32, i32
  }
  func.func @transform_1(%arg0: i32, %arg1: i32) -> (i32, i32, i32) {
    %c0_i32 = arith.constant 0 : i32
    %c0_i32_0 = arith.constant 0 : i32
    %c0_i32_1 = arith.constant 0 : i32
    %c0_i32_2 = arith.constant 0 : i32
    return %c0_i32, %c0_i32_0, %c0_i32_1 : i32, i32, i32
  }
  func.func @transform_2(%arg0: i32, %arg1: i32) -> (i32, i32, i32) {
    %c0_i32 = arith.constant 0 : i32
    %c0_i32_0 = arith.constant 0 : i32
    %c0_i32_1 = arith.constant 0 : i32
    %c0_i32_2 = arith.constant 0 : i32
    return %c0_i32, %c0_i32_0, %c0_i32_1 : i32, i32, i32
  }
  func.func @transform_3(%arg0: i32, %arg1: i32) -> (i32, i32, i32) {
    %c0_i32 = arith.constant 0 : i32
    %c0_i32_0 = arith.constant 0 : i32
    return %arg0, %c0_i32, %arg1 : i32, i32, i32
  }
}

</mosaic_0001>

<bundles_post_ra>
// kernel: tpu_custom_call.1
= control target key start
LH: loop header
LB: loop body
LE: loop exit
PB: predicated region body
PF: predicated region fallthrough
CT: control target
= control target key end

     0   :  { %8 = vsyncpa [#allocation3], 0  ;;  %s764_s0 = inlined_call_operand.hbm [shape: f32[2,4,256], index: 0, kind: input, shape index: {}]   ;;  %s765_s1 = inlined_call_operand.vmem [shape: f32[1,4,1], index: 1, kind: input, shape index: {}]   ;;  %s766_s2 = inlined_call_operand.vmem [shape: f32[1,4,1], index: 2, kind: input, shape index: {}]   ;;  %s767_s3 = inlined_call_operand.hbm [shape: f32[2,4,256], index: 3, kind: output, shape index: {}]  }
   0x1   :  { %10 = vsyncpa [#allocation3 + $0x1], 0 }
   0x2   :  { %11 = vsyncpa [#allocation4], 0 }
   0x3   :  { %13 = vsyncpa [#allocation4 + $0x1], 0  ;;  %s620_s12 = smov 0   ;;  %s622_s13 = smov 0  }
   0x4   :  { %s624_s14 = smov 0   ;;  %s626_s15 = smov 0  }
   0x5   :  { %s628_s16 = smov 0   ;;  %s630_s17 = smov 0  }
   0x6 LB: > { %s399_s18 = sadd.s32 4294967295, %s594_s17   ;;  %s400_s19 = sadd.s32 4294967294, %s594_s17   ;;  %s594_s17 = sphi %s630_s17, %s19_s17   ;;  %s590_s16 = sphi %s628_s16, %s779_s16   ;;  %s586_s15 = sphi %s626_s15, %s778_s15   ;;  %s582_s14 = sphi %s624_s14, %s777_s14   ;;  %s578_s13 = sphi %s622_s13, %s776_s13   ;;  %s574_s12 = sphi %s620_s12, %s775_s12  }
   0x7   : > { %s31_s20 = sadd.s32 1, %s590_s16  ;;  %s40_s21 = sadd.s32 1, %s582_s14 }
   0x8   : > { %p33_p0 = scmp.ge.s32.totalorder %s31_s20, 2  ;;  %p47_p1 = scmp.ne.s32.totalorder %s582_s14, %s578_s13 }
   0x9   : > { %p48_p2 = scmp.eq.s32.totalorder %s594_s17, 0  ;;  %p53_p3 = scmp.ne.s32.totalorder %s578_s13, %s574_s12 }
   0xa   : > { %s781_s20 = smov (%p33_p0, %s31_s20), 0  ;;  %p54_p5 = scmp.eq.s32.totalorder %s399_s18, 0 }
   0xb   : > { %p661_p4 = por %p48_p2, %p47_p1  ;;  %s35_s23 = ssub.s32 %s590_s16, %s781_s20 }
   0xc   : > { %p121_p6 = scmp.eq.s32.totalorder %s399_s18, 1  ;;  %p38_p7 = scmp.eq.s32.totalorder %s35_s23, 0 }
   0xd   : > { %p667_p8 = por %p54_p5, %p53_p3  ;;  %p127_p10 = scmp.eq.s32.totalorder %s400_s19, 1 }
   0xe   : > { %p671_p9 = por %p121_p6, %p47_p1  ;;  %p428_p13 = scmp.lt.s32.totalorder %s594_s17, 2 }
   0xf   : > { %s676_s26 = scalar_select %p38_p7, %s582_s14, %s40_s21  }
  0x10   : > { %p678_p11 = por %p127_p10, %p53_p3  ;;  %s153_s28 = sand.u32 1, %s582_s14  }
  0x11   : > { %s403_s29 = sshll.u32 %s153_s28, 3  ;;  %s414_s30 = sshll.u32 %s590_s16, 7 }
  0x12   : > { %s771_s27 = scalar_select %p678_p11, 1, 0 }
  0x13   : > { %s165_s6 = scalar_lea.hbm %s764_s0, %s414_s30  ;;  %s157_s7 = scalar_lea.vmem [#allocation2], %s403_s29 }
  0x14   : > { %s167_s8 = sshll.u32 %s157_s7, 4  ;;  %p691_p0 = pnand %p428_p13, %p661_p4  ;;  %s168_s8 = int_to_ptr.vmem [resolvable:$true] %s167_s8 }
  0x15   : > { %p406_p1 = scmp.ge.s32.totalorder %s594_s17, 1  ;;  %p172_p2 = scmp.lt.s32.totalorder %s594_s17, 3 }
  0x16   : > { %s154_s10 = scalar_lea.sflag [#allocation3], %s153_s28  ;;  %p488_p3 = pneg %p691_p0 }
  0x17   : > { %s499_s11 = scalar_lea.vmem %s168_s8, 128  ;;  %s596_s18 = smov [#allocation2]  }
  0x18   : > { %p500_p5 = scmp.ne.s32.totalorder %s168_s8, %s499_s11  ;;  %s504_s19 = sshll.u32 %s596_s18, 4  ;;  %s505_s19 = int_to_ptr.vmem [resolvable:$false] %s504_s19 }
  0x19   : > { %s506_s21 = scalar_lea.vmem %s505_s19, 256  ;;  %p507_p10 = scmp.lt.s32.totalorder %s168_s8, %s505_s19 }
  0x1a   : > { %p502_p6 = pnand %p500_p5, %p488_p3  ;;  %p508_p12 = scmp.lt.s32.totalorder %s506_s21, %s499_s11 }
  0x1c   : > { %p503_p7 = pneg %p502_p6  ;;  %p509_p4 = por %p508_p12, %p507_p10 }
  0x1e   : > { %p510_p13 = pnand %p509_p4, %p503_p7 }
  0x20   : > { %513 = shalt.err (!%p510_p13)
}
  0x21   : > { %423 = dma.hbm_to_vmem [thread:$0]  (!%p691_p0), %s165_s6, 128, %s168_s8, %s154_s10  }
  0x22   : > { %p173_p11 = pnand %p406_p1, %p172_p2 }
  0x23   : > { %s706_s22 = sand.u32 (!%p173_p11), 1, %s578_s13  }
  0x24   : > { %176 = sbr.rel (%p173_p11) target bundleno = 189 (0xbd), region = 32  ;;  %s407_s23 = sshll.u32 (!%p173_p11), %s706_s22, 3 }
  0x25   : > { %s179_s28 = scalar_lea.sflag (!%p173_p11), [#allocation3], %s706_s22  ;;  %s182_s29 = scalar_lea.vmem (!%p173_p11), [#allocation2], %s407_s23 }
  0x29   : > { %565 = dma.done.wait (%p667_p8), %s179_s28, 128  }
  0x2a   : > { %567 = vsyncadd (%p667_p8), %s179_s28, 4294967168  ;;  %v597_v0 = vmov 0   ;;  %v259_v1 = vld [vmem:[%s765_s1] sm:$0xf]  ;;  %vm211_vm0 = vcmask 1043456   ;;  %v278_v49 = vlaneseq  ;;  %s415_s24 = sshll.u32 %s586_s15, 7 }
  0x2b   : > { %480 = vset.pattern.permute.xlu0 %v597_v0  ;;  %v260_v2 = vld [vmem:[%s766_s2] sm:$0xf]  ;;  %v598_v47 = vmov 839922192   ;;  %s204_s7 = scalar_lea.vmem [#allocation5], %s407_s23  ;;  %s313_s11 = scalar_lea.hbm %s767_s3, %s415_s24 }
  0x2c   : > { %273 = vperm.xlu0 %480, %v259_v1   ;;  %v207_v3 = vld [vmem:[%s182_s29] sm:$0xff]  ;;  %v276_v48 = vunpack.c.l.s4 %v598_v47  ;;  %v279_v52 = vshrl.u32 %v278_v49, 7  ;;  %s315_s8 = sshll.u32 %s204_s7, 4  ;;  %s299_s18 = scalar_lea.sflag [#allocation4], %s706_s22  ;;  %s316_s8 = int_to_ptr.vmem [resolvable:$true] %s315_s8 }
  0x2d   : > { %v209_v4 = vcombine.high %v207_v3, %v207_v3  ;;  %v229_v5 = vmul.f32 %v207_v3, %v207_v3  ;;  %v212_v6 = vsel %vm211_vm0, %v207_v3, 0.0  ;;  %s514_s19 = scalar_lea.vmem %s316_s8, 128  ;;  %s599_s21 = smov [#allocation5]  }
  0x2e   : > { %v213_v9 = vrot.slane %v212_v6, 4  ;;  %v277_v51 = vunpack.c.0.s8 %v276_v48  ;;  %p515_p8 = scmp.ne.s32.totalorder %s316_s8, %s514_s19  ;;  %s518_s15 = sshll.u32 %s599_s21, 4  ;;  %s519_s15 = int_to_ptr.vmem [resolvable:$false] %s518_s15 }
  0x2f   : > { %v219_v7 = vsel %vm211_vm0, %v209_v4, 0.0  ;;  %v231_v8 = vcombine.high %v229_v5, %v229_v5  ;;  %v233_v11 = vsel %vm211_vm0, %v229_v5, 0.0  ;;  %s520_s23 = scalar_lea.vmem %s519_s15, 256  ;;  %p521_p0 = scmp.lt.s32.totalorder %s316_s8, %s519_s15 }
  0x30   : > { %286 = vperm.xlu0 %480, %v260_v2   ;;  %v220_v10 = vrot.slane %v219_v7, 4  ;;  %v214_v13 = vadd.f32 %v213_v9, %v212_v6  ;;  %v234_v14 = vrot.slane %v233_v11, 4  ;;  %v280_v55 = vsub.s32 %v277_v51, %v279_v52  ;;  %p516_p11 = pnand %p515_p8, %p671_p9  ;;  %p522_p1 = scmp.lt.s32.totalorder %s520_s23, %s514_s19 }
  0x31   : > { %v240_v12 = vsel %vm211_vm0, %v231_v8, 0.0 }
  0x32   : > { %v221_v15 = vadd.f32 %v220_v10, %v219_v7  ;;  %v241_v16 = vrot.slane %v240_v12, 4  ;;  %v215_v17 = vrot.slane %v214_v13, 2  ;;  %v235_v18 = vadd.f32 %v234_v14, %v233_v11  ;;  %p517_p12 = pneg %p516_p11  ;;  %p523_p2 = por %p522_p1, %p521_p0 }
  0x34   : > { %v222_v19 = vrot.slane %v221_v15, 2  ;;  %v242_v20 = vadd.f32 %v241_v16, %v240_v12  ;;  %v216_v21 = vadd.f32 %v215_v17, %v214_v13  ;;  %v236_v22 = vrot.slane %v235_v18, 2  ;;  %p524_p3 = pnand %p523_p2, %p517_p12 }
  0x36   : > { %v223_v23 = vadd.f32 %v222_v19, %v221_v15  ;;  %v243_v24 = vrot.slane %v242_v20, 2  ;;  %v217_v25 = vrot.slane %v216_v21, 1  ;;  %v237_v26 = vadd.f32 %v236_v22, %v235_v18 }
  0x38   : > { %v224_v27 = vrot.slane %v223_v23, 1  ;;  %v244_v28 = vadd.f32 %v243_v24, %v242_v20  ;;  %v218_v29 = vadd.f32 %v217_v25, %v216_v21  ;;  %v238_v30 = vrot.slane %v237_v26, 1 }
  0x3a   : > { %v225_v31 = vadd.f32 %v224_v27, %v223_v23  ;;  %v245_v32 = vrot.slane %v244_v28, 1  ;;  %v227_v33 = vmul.f32 0.25, %v218_v29  ;;  %v239_v34 = vadd.f32 %v238_v30, %v237_v26 }
  0x3c   : > { %v228_v35 = vmul.f32 0.25, %v225_v31  ;;  %v246_v36 = vadd.f32 %v245_v32, %v244_v28  ;;  %v247_v37 = vmul.f32 0.25, %v239_v34  ;;  %v249_v38 = vmul.f32 %v227_v33, %v227_v33 }
  0x3e   : > { %v248_v39 = vmul.f32 0.25, %v246_v36  ;;  %v250_v40 = vmul.f32 %v228_v35, %v228_v35  ;;  %v251_v41 = vsub.f32 %v247_v37, %v249_v38  ;;  %v263_v53 = vcombine.low %v227_v33, %v228_v35 }
  0x40   : > { %v252_v42 = vsub.f32 %v248_v39, %v250_v40  ;;  %v253_v43 = vmax.f32 %v251_v41, 0.0  ;;  %v265_v56 = vsub.f32 %v207_v3, %v263_v53 }
  0x42   : > { %v254_v44 = vmax.f32 %v252_v42, 0.0  ;;  %v255_v45 = vadd.f32 1e-06, %v253_v43 }
  0x44   : > { %v256_v46 = vadd.f32 1e-06, %v254_v44  ;;  %482 = vrsqrt.f32 %v255_v45 }
  0x46   : > { %484 = vrsqrt.f32 %v256_v46 }
  0x51   : > { %v483_v50 = vpop.eup %482 }
  0x53   : > { %v485_v54 = vpop.eup %484 }
  0x54   : > { %v268_v57 = vcombine.low %v483_v50, %v485_v54 }
  0x56   : > { %v270_v59 = vmul.f32 %v268_v57, %v265_v56 }
  0xa7   : > { %v274_v58 = vpop.permute.xlu0 %273 }
  0xa8   : > { %v281_v60 = vrot.slane %v274_v58, %v280_v55 }
  0xaa   : > { %v283_v62 = vmul.f32 %v281_v60, %v270_v59 }
  0xab   : > { %v287_v61 = vpop.permute.xlu0 %286 }
  0xac   : > { %v294_v63 = vrot.slane %v287_v61, %v280_v55 }
  0xae   : > { %v296_v0 = vadd.f32 %v294_v63, %v283_v62 }
  0xb0   : > { %297 = vst [vmem:[%s204_s7] sm:$0xff] %v296_v0 }
  0xb1   : > { %527 = shalt.err (!%p524_p3)
}
  0xb2   : > { %s528_s28 = scalar_lea.hbm %s313_s11, 128  ;;  %s532_s30 = scalar_lea.hbm %s767_s3, 256 }
  0xb3   : > { %p529_p5 = scmp.ne.s32.totalorder %s313_s11, %s528_s28  ;;  %p533_p10 = scmp.lt.s32.totalorder %s313_s11, %s767_s3 }
  0xb4   : > { %p534_p4 = scmp.lt.s32.totalorder %s532_s30, %s528_s28 }
  0xb5   : > { %p530_p6 = pnand %p529_p5, %p671_p9 }
  0xb6   : > { %p535_p13 = por %p534_p4, %p533_p10 }
  0xb7   : > { %p531_p7 = pneg %p530_p6 }
  0xb9   : > { %p536_p8 = pnand %p535_p13, %p531_p7 }
  0xbb   : > { %539 = shalt.err (!%p536_p8)
}
  0xbc   : > { %418 = dma.vmem_to_hbm [thread:$0]  (%p671_p9), %s316_s8, 128, %s313_s11, %s299_s18  }
  0xbd PF: > { %s327_s6 = sand.u32 1, %s574_s12   ;;  %p773_p11 = scmp.ne.s32.totalorder %s771_s27, 0 }
  0xbe   : > { %p774_p12 = scmp.ge.s32.totalorder %s594_s17, 2  ;;  %s328_s24 = scalar_lea.sflag [#allocation4], %s327_s6 }
  0xc0   : > { %p425_p0 = pnand %p774_p12, %p773_p11 }
  0xc2   : > { %p426_p1 = pneg %p425_p0 }
  0xc4   : > { %569 = dma.done.wait (%p426_p1), %s328_s24, 128  }
  0xc5   : > { %571 = vsyncadd (%p426_p1), %s328_s24, 4294967168  ;;  %s19_s17 = sadd.s32 1, %s594_s17   ;;  %s775_s12 = smov %s578_s13 }
  0xc6   : > { %p16_p2 = scmp.ge.s32.totalorder %s19_s17, 4   ;;  %s776_s13 = smov %s582_s14 }
  0xc7   : > { %s777_s14 = smov %s676_s26  ;;  %s778_s15 = smov %s590_s16 }
  0xc8   : > { %s779_s16 = smov %s781_s20  ;;  %18 = sbr.rel (!%p16_p2) target bundleno = 6 (0x6), region = 77 }
  0xcd   :  { %333 = vsyncpa [#allocation3], 1 }
  0xce   :  { %335 = vsyncpa [#allocation3 + $0x1], 1 }
  0xcf   :  { %336 = vsyncpa [#allocation4], 1 }
  0xd0   :  { %338 = vsyncpa [#allocation4 + $0x1], 1 }

</bundles_post_ra>
